<compile_context>
chip_gen: v7x
topology: tpu7x:2x2x1
jax: 0.10.0
libtpu: 0.0.40
codegen_flags: <defaults>
</compile_context>

<pallas_src>
import functools

import jax
import jax.numpy as jnp
from jax import lax
from jax.experimental import pallas as pl
from jax.experimental.pallas import tpu as pltpu

LN_EPS = 1e-5  # nn.LayerNorm default


def _round_up(n, m):
    return ((n + m - 1) // m) * m


def _tpu_defaults():
    """Generation-aware VMEM cap and 2-TensorCore hint (best-effort, safe fallback)."""
    phys_vmem = 128 << 20                                     # v5e / v6e physical VMEM
    try:
        phys_vmem = int(getattr(pltpu.get_tpu_info(), "vmem_capacity_bytes", phys_vmem))
    except Exception:
        pass
    two_tc = phys_vmem <= (64 << 20)                          # v7x: 64 MiB per TC, 2 TCs/chip
    vmem_cap = (56 << 20) if two_tc else (100 << 20)
    return vmem_cap, two_tc


def _mlp_block(x_bf16, x_skip_f32, w_bf16, b, gamma, beta, inv_n, skip):
    """One MlpBlock: linear -> (skip) -> LayerNorm over the TRUE feature count -> ReLU.

    x_bf16     : (tb, K) bf16 matmul operand (padded lanes exactly zero)
    x_skip_f32 : (tb, F) f32 skip operand (None when skip=False)
    w_bf16     : (K, F) bf16 weights (padded rows/cols zero)
    b/gamma/beta : (1, F) f32 rows -- broadcast along sublanes, never materialized to (tb, F)
    inv_n      : 1 / true feature count (python float)

    Padded lanes of the result are exactly zero (gamma/beta are zero there), so the
    unmasked lane reductions of the NEXT block remain correct without any mask.
    """
    out = jnp.dot(x_bf16, w_bf16, preferred_element_type=jnp.float32) + b     # (tb, F) f32
    if skip:
        out = out + x_skip_f32
    # LN stats over the true count; padded lanes of `out` are zero so plain sums are exact.
    # var = E[x^2] - mean^2 keeps the two XLU reductions independent (no serialized
    # `centered` intermediate) and needs no mask; clamp guards tiny negative round-off.
    mean = jnp.sum(out, axis=-1, keepdims=True) * inv_n
    sumsq = jnp.sum(out * out, axis=-1, keepdims=True) * inv_n
    var = jnp.maximum(sumsq - mean * mean, 0.0)
    out = (out - mean) * lax.rsqrt(var + LN_EPS)
    out = out * gamma + beta                                  # padded lanes -> exactly 0
    return jnp.maximum(out, 0.0)                              # ReLU


def _encoder_kernel(num_hidden_layers, hidden_true, output_true,
                    x_ref, wh_ref, wm_ref, wt_ref, hrow_ref, orow_ref, out_ref):
    inv_h = 1.0 / float(hidden_true)
    inv_o = 1.0 / float(output_true)

    hrow = hrow_ref[...]          # (8, H) rows: 0..2 = head b/g/beta, 3..5 = hidden b/g/beta
    orow = orow_ref[...]          # (8, O) rows: 0..2 = tail b/g/beta

    def row(p, r):
        return p[r:r + 1, :]      # (1, F) row, broadcasts along sublanes

    # ---- head: input -> hidden (x arrives bf16 from the wrapper; feeds the MXU directly) ----
    h = _mlp_block(x_ref[...], None, wh_ref[...],
                   row(hrow, 0), row(hrow, 1), row(hrow, 2), inv_h, skip=False)

    # ---- hidden blocks: hidden -> hidden, skip_connect=True, SAME weights each iteration
    #      (the PyTorch list comprehension reuses one module instance). ----
    w_hid = wm_ref[...]
    b_h, g_h, bt_h = row(hrow, 3), row(hrow, 4), row(hrow, 5)

    # TODO(synk): if profiling shows this shared matmul MXU-push bound (v6e/v7x), hold w_hid
    # in MXU staging via pltpu.matmul_push_rhs / matmul_acc_lhs across iterations.
    def hidden_body(_, h_carry):
        return _mlp_block(h_carry.astype(jnp.bfloat16), h_carry, w_hid,
                          b_h, g_h, bt_h, inv_h, skip=True)

    h = lax.fori_loop(0, num_hidden_layers, hidden_body, h,
                      unroll=True if num_hidden_layers <= 8 else 4)

    # ---- tail: hidden -> output ----
    y = _mlp_block(h.astype(jnp.bfloat16), None, wt_ref[...],
                   row(orow, 0), row(orow, 1), row(orow, 2), inv_o, skip=False)
    out_ref[...] = y.astype(out_ref.dtype)


def mlp_encoder_pallas(x, params, num_hidden_layers, *, batch_tile=256):
    """x: (B, input_size) f32.  params: dict of true-size f32 weights (see init_params)."""
    B, input_size = x.shape
    hidden_size = params["w_hid"].shape[0]
    output_size = params["w_tail"].shape[1]

    # Lane-dense padded feature widths (multiples of 128).
    in_p = _round_up(input_size, 128)
    hid_p = _round_up(hidden_size, 128)
    out_p = _round_up(output_size, 128)

    vmem_cap, two_tc = _tpu_defaults()

    # ---- batch tiling: near-equal tiles (multiple of 16 for bf16 sublane packing),
    # bounded padding waste, and >=2 grid steps on 2-TC chips (v7x) so the 'parallel'
    # batch axis shards across both TensorCores. ----
    nsteps = max(1, -(-B // batch_tile))
    if two_tc and B >= 32:
        nsteps = max(nsteps, 2)
    tb = _round_up(max(-(-B // nsteps), 16), 16)
    B_p = _round_up(B, tb)
    grid = (B_p // tb,)

    def pad2(a, r, c, dtype=jnp.float32):
        return jnp.pad(a, ((0, r - a.shape[0]), (0, c - a.shape[1]))).astype(dtype)

    # Activations enter as bf16 (halves the per-step x DMA); weights stored bf16 (MXU rate,
    # half the HBM/VMEM traffic); LN / bias math stays f32 inside the kernel.
    x_p = pad2(x, B_p, in_p, jnp.bfloat16)
    wh = pad2(params["w_head"], in_p, hid_p, jnp.bfloat16)
    wm = pad2(params["w_hid"], hid_p, hid_p, jnp.bfloat16)
    wt = pad2(params["w_tail"], hid_p, out_p, jnp.bfloat16)

    # Pack the nine (1, F) bias/gamma/beta rows into two (8, F) slabs -> 2 resident DMAs.
    def pack_rows(rows, width):
        slab = jnp.zeros((8, width), jnp.float32)
        for r, v in enumerate(rows):
            v = jnp.asarray(v, jnp.float32).reshape(1, -1)
            slab = slab.at[r:r + 1, :v.shape[1]].set(v)
        return slab

    hrow = pack_rows([params["b_head"], params["g_head"], params["beta_head"],
                      params["b_hid"], params["g_hid"], params["beta_hid"]], hid_p)
    orow = pack_rows([params["b_tail"], params["g_tail"], params["beta_tail"]], out_p)

    kernel = functools.partial(_encoder_kernel, num_hidden_layers, hidden_size, output_size)

    # Constant-index (grid-resident) blocks: single-buffered -> no double-buffer VMEM waste.
    def resident(shape):
        return pl.BlockSpec(shape, lambda i: (0, 0), pipeline_mode=pl.Buffered(1))

    # TODO(synk): on v7x with very large hidden sizes (hid_p**2 bf16 >= ~32 MiB) switch the
    # hidden matmul to a K/N-tiled inner pipeline instead of keeping w_hid fully resident.
    in_specs = [
        pl.BlockSpec((tb, in_p), lambda i: (i, 0)),      # x, tiled over batch
        resident((in_p, hid_p)),                          # head W
        resident((hid_p, hid_p)),                         # shared hidden W
        resident((hid_p, out_p)),                         # tail W
        resident((8, hid_p)),                             # head+hidden b/gamma/beta rows
        resident((8, out_p)),                             # tail b/gamma/beta rows
    ]
    out_spec = pl.BlockSpec((tb, out_p), lambda i: (i, 0))

    # Cost estimate (helps XLA schedule around the custom call).
    flops = 2 * B_p * (in_p * hid_p + num_hidden_layers * hid_p * hid_p + hid_p * out_p)
    weight_bytes = 2 * (in_p * hid_p + hid_p * hid_p + hid_p * out_p)   # bf16, single-buffered
    row_bytes = 4 * 8 * (hid_p + out_p)
    bytes_accessed = int(B_p * in_p * 2 + B_p * out_p * 4 + weight_bytes + row_bytes)
    cost = pl.CostEstimate(flops=int(flops),
                           transcendentals=int(B_p * (num_hidden_layers + 2)),
                           bytes_accessed=bytes_accessed)

    # VMEM limit sized from the real footprint (weights single-buffered, x/out double-buffered,
    # f32 intermediates), capped per generation (~56 MiB on v7x, ~100 MiB on v5e/v6e).
    io_bytes = 2 * (tb * in_p * 2 + tb * out_p * 4)
    act_bytes = 6 * tb * hid_p * 4
    vmem_est = weight_bytes + row_bytes + io_bytes + act_bytes + (4 << 20)
    vmem_limit = int(min(max(vmem_est, 32 << 20), vmem_cap))

    out_padded = pl.pallas_call(
        kernel,
        out_shape=jax.ShapeDtypeStruct((B_p, out_p), x.dtype),
        grid_spec=pltpu.PrefetchScalarGridSpec(
            num_scalar_prefetch=0,
            grid=grid,
            in_specs=in_specs,
            out_specs=out_spec,
        ),
        compiler_params=pltpu.CompilerParams(
            dimension_semantics=("parallel",),
            vmem_limit_bytes=vmem_limit),
        cost_estimate=cost,
    )(x_p, wh, wm, wt, hrow, orow)

    return out_padded[:B, :output_size]


def init_params(key, input_size, hidden_size, output_size):
    """nn.Linear-style U(-1/sqrt(fan_in), 1/sqrt(fan_in)) init; LayerNorm gamma=1, beta=0.
    Weights stored transposed, (in, out), in f32 (cast/pad happens in the wrapper)."""
    ks = jax.random.split(key, 6)

    def linear(kw, kb, fan_in, fan_out):
        bound = 1.0 / jnp.sqrt(fan_in)
        w = jax.random.uniform(kw, (fan_in, fan_out), jnp.float32, -bound, bound)
        b = jax.random.uniform(kb, (1, fan_out), jnp.float32, -bound, bound)
        return w, b

    w_head, b_head = linear(ks[0], ks[1], input_size, hidden_size)
    w_hid, b_hid = linear(ks[2], ks[3], hidden_size, hidden_size)
    w_tail, b_tail = linear(ks[4], ks[5], hidden_size, output_size)

    return dict(
        w_head=w_head, b_head=b_head,
        g_head=jnp.ones((1, hidden_size), jnp.float32),
        beta_head=jnp.zeros((1, hidden_size), jnp.float32),
        w_hid=w_hid, b_hid=b_hid,
        g_hid=jnp.ones((1, hidden_size), jnp.float32),
        beta_hid=jnp.zeros((1, hidden_size), jnp.float32),
        w_tail=w_tail, b_tail=b_tail,
        g_tail=jnp.ones((1, output_size), jnp.float32),
        beta_tail=jnp.zeros((1, output_size), jnp.float32),
    )


def mlp_encoder_ref(x, params, num_hidden_layers):
    """Pure-JAX reference matching the kernel's numerics (bf16 matmul operands, f32 LN)."""
    def block(h, w, b, g, beta, skip):
        o = jnp.dot(h.astype(jnp.bfloat16), w.astype(jnp.bfloat16),
                    preferred_element_type=jnp.float32) + b
        if skip:
            o = o + h
        m = jnp.mean(o, axis=-1, keepdims=True)
        v = jnp.mean((o - m) ** 2, axis=-1, keepdims=True)
        o = (o - m) * lax.rsqrt(v + LN_EPS) * g + beta
        return jnp.maximum(o, 0.0)

    h = block(x, params["w_head"], params["b_head"],
              params["g_head"], params["beta_head"], False)
    for _ in range(num_hidden_layers):
        h = block(h, params["w_hid"], params["b_hid"],
                  params["g_hid"], params["beta_hid"], True)
    return block(h, params["w_tail"], params["b_tail"],
                 params["g_tail"], params["beta_tail"], False)


if __name__ == "__main__":
    # Small shapes consistent with the module: flat features in, flat features out.
    batch = 8
    input_size = 16
    hidden_size = 32
    output_size = 16
    num_hidden_layers = 3

    key = jax.random.PRNGKey(0)
    kx, kp = jax.random.split(key)
    x = jax.random.normal(kx, (batch, input_size), dtype=jnp.float32)
    params = init_params(kp, input_size, hidden_size, output_size)

    out = mlp_encoder_pallas(x, params, num_hidden_layers)
    out = jax.block_until_ready(out)

    ref = mlp_encoder_ref(x, params, num_hidden_layers)
    assert out.shape == (batch, output_size)
    assert jnp.allclose(out, ref, atol=1e-3, rtol=1e-3), "mismatch vs reference"

    print("KERNEL_OK")
</pallas_src>

<mosaic_0001>
module attributes {stable_mosaic.version = 11 : i64} {
  func.func @_encoder_kernel(%arg0: i32, %arg1: memref<16x128xbf16, #tpu.memory_space<vmem>>, %arg2: memref<128x128xbf16, #tpu.memory_space<vmem>>, %arg3: memref<128x128xbf16, #tpu.memory_space<vmem>>, %arg4: memref<128x128xbf16, #tpu.memory_space<vmem>>, %arg5: memref<8x128xf32, #tpu.memory_space<vmem>>, %arg6: memref<8x128xf32, #tpu.memory_space<vmem>>, %arg7: memref<16x128xf32, #tpu.memory_space<vmem>>) attributes {dimension_semantics = [#tpu.dimension_semantics<parallel>], iteration_bounds = array<i64: 1>, scalar_prefetch = 0 : i64, scratch_operands = 0 : i64, tpu.core_type = #tpu.core_type<tc>, window_params = [{transform_indices = @transform_0, window_bounds = array<i64: 16, 128>}, {pipeline_mode = #tpu.pipeline_mode<synchronous>, transform_indices = @transform_1, window_bounds = array<i64: 128, 128>}, {pipeline_mode = #tpu.pipeline_mode<synchronous>, transform_indices = @transform_2, window_bounds = array<i64: 128, 128>}, {pipeline_mode = #tpu.pipeline_mode<synchronous>, transform_indices = @transform_3, window_bounds = array<i64: 128, 128>}, {pipeline_mode = #tpu.pipeline_mode<synchronous>, transform_indices = @transform_4, window_bounds = array<i64: 8, 128>}, {pipeline_mode = #tpu.pipeline_mode<synchronous>, transform_indices = @transform_5, window_bounds = array<i64: 8, 128>}, {transform_indices = @transform_6, window_bounds = array<i64: 16, 128>}]} {
    %c0 = arith.constant 0 : index
    %c0_0 = arith.constant 0 : index
    %0 = vector.load %arg5[%c0, %c0_0] : memref<8x128xf32, #tpu.memory_space<vmem>>, vector<8x128xf32>
    %c0_1 = arith.constant 0 : index
    %c0_2 = arith.constant 0 : index
    %1 = vector.load %arg6[%c0_1, %c0_2] : memref<8x128xf32, #tpu.memory_space<vmem>>, vector<8x128xf32>
    %c0_3 = arith.constant 0 : index
    %c0_4 = arith.constant 0 : index
    %2 = vector.load %arg1[%c0_3, %c0_4] : memref<16x128xbf16, #tpu.memory_space<vmem>>, vector<16x128xbf16>
    %c0_5 = arith.constant 0 : index
    %c0_6 = arith.constant 0 : index
    %3 = vector.load %arg2[%c0_5, %c0_6] : memref<128x128xbf16, #tpu.memory_space<vmem>>, vector<128x128xbf16>
    %4 = vector.extract_strided_slice %0 {offsets = [0, 0], sizes = [1, 128], strides = [1, 1]} : vector<8x128xf32> to vector<1x128xf32>
    %5 = vector.extract_strided_slice %0 {offsets = [1, 0], sizes = [1, 128], strides = [1, 1]} : vector<8x128xf32> to vector<1x128xf32>
    %6 = vector.extract_strided_slice %0 {offsets = [2, 0], sizes = [1, 128], strides = [1, 1]} : vector<8x128xf32> to vector<1x128xf32>
    %cst = arith.constant dense<0.000000e+00> : vector<16x128xf32>
    %7 = tpu.matmul %2, %3, %cst {dimension_numbers = #tpu.dot_dimension_numbers<[1], [0], [0], [1], [0, 0, 1, 1], [], []>} : vector<16x128xbf16>, vector<128x128xbf16>, vector<16x128xf32> -> vector<16x128xf32>
    %8 = vector.broadcast %4 : vector<1x128xf32> to vector<16x128xf32>
    %9 = arith.addf %7, %8 : vector<16x128xf32>
    %cst_7 = arith.constant dense<0.000000e+00> : vector<16xf32>
    %10 = vector.multi_reduction <add>, %9, %cst_7 [1] : vector<16x128xf32> to vector<16xf32>
    %11 = vector.shape_cast %10 : vector<16xf32> to vector<16x1xf32>
    %cst_8 = arith.constant 3.125000e-02 : f32
    %12 = vector.broadcast %cst_8 : f32 to vector<16x1xf32>
    %13 = arith.mulf %11, %12 : vector<16x1xf32>
    %14 = arith.mulf %9, %9 : vector<16x128xf32>
    %cst_9 = arith.constant dense<0.000000e+00> : vector<16xf32>
    %15 = vector.multi_reduction <add>, %14, %cst_9 [1] : vector<16x128xf32> to vector<16xf32>
    %16 = vector.shape_cast %15 : vector<16xf32> to vector<16x1xf32>
    %cst_10 = arith.constant 3.125000e-02 : f32
    %17 = vector.broadcast %cst_10 : f32 to vector<16x1xf32>
    %18 = arith.mulf %16, %17 : vector<16x1xf32>
    %19 = arith.mulf %13, %13 : vector<16x1xf32>
    %20 = arith.subf %18, %19 : vector<16x1xf32>
    %cst_11 = arith.constant 0.000000e+00 : f32
    %21 = vector.broadcast %cst_11 : f32 to vector<16x1xf32>
    %22 = arith.maximumf %20, %21 : vector<16x1xf32>
    %23 = vector.broadcast %13 : vector<16x1xf32> to vector<16x128xf32>
    %24 = arith.subf %9, %23 : vector<16x128xf32>
    %cst_12 = arith.constant 9.99999974E-6 : f32
    %25 = vector.broadcast %cst_12 : f32 to vector<16x1xf32>
    %26 = arith.addf %22, %25 : vector<16x1xf32>
    %27 = math.rsqrt %26 : vector<16x1xf32>
    %28 = vector.broadcast %27 : vector<16x1xf32> to vector<16x128xf32>
    %29 = arith.mulf %24, %28 : vector<16x128xf32>
    %30 = vector.broadcast %5 : vector<1x128xf32> to vector<16x128xf32>
    %31 = arith.mulf %29, %30 : vector<16x128xf32>
    %32 = vector.broadcast %6 : vector<1x128xf32> to vector<16x128xf32>
    %33 = arith.addf %31, %32 : vector<16x128xf32>
    %cst_13 = arith.constant 0.000000e+00 : f32
    %34 = vector.broadcast %cst_13 : f32 to vector<16x128xf32>
    %35 = arith.maximumf %33, %34 : vector<16x128xf32>
    %c0_14 = arith.constant 0 : index
    %c0_15 = arith.constant 0 : index
    %36 = vector.load %arg3[%c0_14, %c0_15] : memref<128x128xbf16, #tpu.memory_space<vmem>>, vector<128x128xbf16>
    %37 = vector.extract_strided_slice %0 {offsets = [3, 0], sizes = [1, 128], strides = [1, 1]} : vector<8x128xf32> to vector<1x128xf32>
    %38 = vector.extract_strided_slice %0 {offsets = [4, 0], sizes = [1, 128], strides = [1, 1]} : vector<8x128xf32> to vector<1x128xf32>
    %39 = vector.extract_strided_slice %0 {offsets = [5, 0], sizes = [1, 128], strides = [1, 1]} : vector<8x128xf32> to vector<1x128xf32>
    %c0_i32 = arith.constant 0 : i32
    %40 = arith.truncf %35 : vector<16x128xf32> to vector<16x128xbf16>
    %cst_16 = arith.constant dense<0.000000e+00> : vector<16x128xf32>
    %41 = tpu.matmul %40, %36, %cst_16 {dimension_numbers = #tpu.dot_dimension_numbers<[1], [0], [0], [1], [0, 0, 1, 1], [], []>} : vector<16x128xbf16>, vector<128x128xbf16>, vector<16x128xf32> -> vector<16x128xf32>
    %42 = vector.broadcast %37 : vector<1x128xf32> to vector<16x128xf32>
    %43 = arith.addf %41, %42 : vector<16x128xf32>
    %44 = arith.addf %43, %35 : vector<16x128xf32>
    %cst_17 = arith.constant dense<0.000000e+00> : vector<16xf32>
    %45 = vector.multi_reduction <add>, %44, %cst_17 [1] : vector<16x128xf32> to vector<16xf32>
    %46 = vector.shape_cast %45 : vector<16xf32> to vector<16x1xf32>
    %cst_18 = arith.constant 3.125000e-02 : f32
    %47 = vector.broadcast %cst_18 : f32 to vector<16x1xf32>
    %48 = arith.mulf %46, %47 : vector<16x1xf32>
    %49 = arith.mulf %44, %44 : vector<16x128xf32>
    %cst_19 = arith.constant dense<0.000000e+00> : vector<16xf32>
    %50 = vector.multi_reduction <add>, %49, %cst_19 [1] : vector<16x128xf32> to vector<16xf32>
    %51 = vector.shape_cast %50 : vector<16xf32> to vector<16x1xf32>
    %cst_20 = arith.constant 3.125000e-02 : f32
    %52 = vector.broadcast %cst_20 : f32 to vector<16x1xf32>
    %53 = arith.mulf %51, %52 : vector<16x1xf32>
    %54 = arith.mulf %48, %48 : vector<16x1xf32>
    %55 = arith.subf %53, %54 : vector<16x1xf32>
    %cst_21 = arith.constant 0.000000e+00 : f32
    %56 = vector.broadcast %cst_21 : f32 to vector<16x1xf32>
    %57 = arith.maximumf %55, %56 : vector<16x1xf32>
    %58 = vector.broadcast %48 : vector<16x1xf32> to vector<16x128xf32>
    %59 = arith.subf %44, %58 : vector<16x128xf32>
    %cst_22 = arith.constant 9.99999974E-6 : f32
    %60 = vector.broadcast %cst_22 : f32 to vector<16x1xf32>
    %61 = arith.addf %57, %60 : vector<16x1xf32>
    %62 = math.rsqrt %61 : vector<16x1xf32>
    %63 = vector.broadcast %62 : vector<16x1xf32> to vector<16x128xf32>
    %64 = arith.mulf %59, %63 : vector<16x128xf32>
    %65 = vector.broadcast %38 : vector<1x128xf32> to vector<16x128xf32>
    %66 = arith.mulf %64, %65 : vector<16x128xf32>
    %67 = vector.broadcast %39 : vector<1x128xf32> to vector<16x128xf32>
    %68 = arith.addf %66, %67 : vector<16x128xf32>
    %cst_23 = arith.constant 0.000000e+00 : f32
    %69 = vector.broadcast %cst_23 : f32 to vector<16x128xf32>
    %70 = arith.maximumf %68, %69 : vector<16x128xf32>
    %c1_i32 = arith.constant 1 : i32
    %71 = arith.truncf %70 : vector<16x128xf32> to vector<16x128xbf16>
    %cst_24 = arith.constant dense<0.000000e+00> : vector<16x128xf32>
    %72 = tpu.matmul %71, %36, %cst_24 {dimension_numbers = #tpu.dot_dimension_numbers<[1], [0], [0], [1], [0, 0, 1, 1], [], []>} : vector<16x128xbf16>, vector<128x128xbf16>, vector<16x128xf32> -> vector<16x128xf32>
    %73 = vector.broadcast %37 : vector<1x128xf32> to vector<16x128xf32>
    %74 = arith.addf %72, %73 : vector<16x128xf32>
    %75 = arith.addf %74, %70 : vector<16x128xf32>
    %cst_25 = arith.constant dense<0.000000e+00> : vector<16xf32>
    %76 = vector.multi_reduction <add>, %75, %cst_25 [1] : vector<16x128xf32> to vector<16xf32>
    %77 = vector.shape_cast %76 : vector<16xf32> to vector<16x1xf32>
    %cst_26 = arith.constant 3.125000e-02 : f32
    %78 = vector.broadcast %cst_26 : f32 to vector<16x1xf32>
    %79 = arith.mulf %77, %78 : vector<16x1xf32>
    %80 = arith.mulf %75, %75 : vector<16x128xf32>
    %cst_27 = arith.constant dense<0.000000e+00> : vector<16xf32>
    %81 = vector.multi_reduction <add>, %80, %cst_27 [1] : vector<16x128xf32> to vector<16xf32>
    %82 = vector.shape_cast %81 : vector<16xf32> to vector<16x1xf32>
    %cst_28 = arith.constant 3.125000e-02 : f32
    %83 = vector.broadcast %cst_28 : f32 to vector<16x1xf32>
    %84 = arith.mulf %82, %83 : vector<16x1xf32>
    %85 = arith.mulf %79, %79 : vector<16x1xf32>
    %86 = arith.subf %84, %85 : vector<16x1xf32>
    %cst_29 = arith.constant 0.000000e+00 : f32
    %87 = vector.broadcast %cst_29 : f32 to vector<16x1xf32>
    %88 = arith.maximumf %86, %87 : vector<16x1xf32>
    %89 = vector.broadcast %79 : vector<16x1xf32> to vector<16x128xf32>
    %90 = arith.subf %75, %89 : vector<16x128xf32>
    %cst_30 = arith.constant 9.99999974E-6 : f32
    %91 = vector.broadcast %cst_30 : f32 to vector<16x1xf32>
    %92 = arith.addf %88, %91 : vector<16x1xf32>
    %93 = math.rsqrt %92 : vector<16x1xf32>
    %94 = vector.broadcast %93 : vector<16x1xf32> to vector<16x128xf32>
    %95 = arith.mulf %90, %94 : vector<16x128xf32>
    %96 = vector.broadcast %38 : vector<1x128xf32> to vector<16x128xf32>
    %97 = arith.mulf %95, %96 : vector<16x128xf32>
    %98 = vector.broadcast %39 : vector<1x128xf32> to vector<16x128xf32>
    %99 = arith.addf %97, %98 : vector<16x128xf32>
    %cst_31 = arith.constant 0.000000e+00 : f32
    %100 = vector.broadcast %cst_31 : f32 to vector<16x128xf32>
    %101 = arith.maximumf %99, %100 : vector<16x128xf32>
    %c2_i32 = arith.constant 2 : i32
    %102 = arith.truncf %101 : vector<16x128xf32> to vector<16x128xbf16>
    %cst_32 = arith.constant dense<0.000000e+00> : vector<16x128xf32>
    %103 = tpu.matmul %102, %36, %cst_32 {dimension_numbers = #tpu.dot_dimension_numbers<[1], [0], [0], [1], [0, 0, 1, 1], [], []>} : vector<16x128xbf16>, vector<128x128xbf16>, vector<16x128xf32> -> vector<16x128xf32>
    %104 = vector.broadcast %37 : vector<1x128xf32> to vector<16x128xf32>
    %105 = arith.addf %103, %104 : vector<16x128xf32>
    %106 = arith.addf %105, %101 : vector<16x128xf32>
    %cst_33 = arith.constant dense<0.000000e+00> : vector<16xf32>
    %107 = vector.multi_reduction <add>, %106, %cst_33 [1] : vector<16x128xf32> to vector<16xf32>
    %108 = vector.shape_cast %107 : vector<16xf32> to vector<16x1xf32>
    %cst_34 = arith.constant 3.125000e-02 : f32
    %109 = vector.broadcast %cst_34 : f32 to vector<16x1xf32>
    %110 = arith.mulf %108, %109 : vector<16x1xf32>
    %111 = arith.mulf %106, %106 : vector<16x128xf32>
    %cst_35 = arith.constant dense<0.000000e+00> : vector<16xf32>
    %112 = vector.multi_reduction <add>, %111, %cst_35 [1] : vector<16x128xf32> to vector<16xf32>
    %113 = vector.shape_cast %112 : vector<16xf32> to vector<16x1xf32>
    %cst_36 = arith.constant 3.125000e-02 : f32
    %114 = vector.broadcast %cst_36 : f32 to vector<16x1xf32>
    %115 = arith.mulf %113, %114 : vector<16x1xf32>
    %116 = arith.mulf %110, %110 : vector<16x1xf32>
    %117 = arith.subf %115, %116 : vector<16x1xf32>
    %cst_37 = arith.constant 0.000000e+00 : f32
    %118 = vector.broadcast %cst_37 : f32 to vector<16x1xf32>
    %119 = arith.maximumf %117, %118 : vector<16x1xf32>
    %120 = vector.broadcast %110 : vector<16x1xf32> to vector<16x128xf32>
    %121 = arith.subf %106, %120 : vector<16x128xf32>
    %cst_38 = arith.constant 9.99999974E-6 : f32
    %122 = vector.broadcast %cst_38 : f32 to vector<16x1xf32>
    %123 = arith.addf %119, %122 : vector<16x1xf32>
    %124 = math.rsqrt %123 : vector<16x1xf32>
    %125 = vector.broadcast %124 : vector<16x1xf32> to vector<16x128xf32>
    %126 = arith.mulf %121, %125 : vector<16x128xf32>
    %127 = vector.broadcast %38 : vector<1x128xf32> to vector<16x128xf32>
    %128 = arith.mulf %126, %127 : vector<16x128xf32>
    %129 = vector.broadcast %39 : vector<1x128xf32> to vector<16x128xf32>
    %130 = arith.addf %128, %129 : vector<16x128xf32>
    %cst_39 = arith.constant 0.000000e+00 : f32
    %131 = vector.broadcast %cst_39 : f32 to vector<16x128xf32>
    %132 = arith.maximumf %130, %131 : vector<16x128xf32>
    %133 = arith.truncf %132 : vector<16x128xf32> to vector<16x128xbf16>
    %c0_40 = arith.constant 0 : index
    %c0_41 = arith.constant 0 : index
    %134 = vector.load %arg4[%c0_40, %c0_41] : memref<128x128xbf16, #tpu.memory_space<vmem>>, vector<128x128xbf16>
    %135 = vector.extract_strided_slice %1 {offsets = [0, 0], sizes = [1, 128], strides = [1, 1]} : vector<8x128xf32> to vector<1x128xf32>
    %136 = vector.extract_strided_slice %1 {offsets = [1, 0], sizes = [1, 128], strides = [1, 1]} : vector<8x128xf32> to vector<1x128xf32>
    %137 = vector.extract_strided_slice %1 {offsets = [2, 0], sizes = [1, 128], strides = [1, 1]} : vector<8x128xf32> to vector<1x128xf32>
    %cst_42 = arith.constant dense<0.000000e+00> : vector<16x128xf32>
    %138 = tpu.matmul %133, %134, %cst_42 {dimension_numbers = #tpu.dot_dimension_numbers<[1], [0], [0], [1], [0, 0, 1, 1], [], []>} : vector<16x128xbf16>, vector<128x128xbf16>, vector<16x128xf32> -> vector<16x128xf32>
    %139 = vector.broadcast %135 : vector<1x128xf32> to vector<16x128xf32>
    %140 = arith.addf %138, %139 : vector<16x128xf32>
    %cst_43 = arith.constant dense<0.000000e+00> : vector<16xf32>
    %141 = vector.multi_reduction <add>, %140, %cst_43 [1] : vector<16x128xf32> to vector<16xf32>
    %142 = vector.shape_cast %141 : vector<16xf32> to vector<16x1xf32>
    %cst_44 = arith.constant 6.250000e-02 : f32
    %143 = vector.broadcast %cst_44 : f32 to vector<16x1xf32>
    %144 = arith.mulf %142, %143 : vector<16x1xf32>
    %145 = arith.mulf %140, %140 : vector<16x128xf32>
    %cst_45 = arith.constant dense<0.000000e+00> : vector<16xf32>
    %146 = vector.multi_reduction <add>, %145, %cst_45 [1] : vector<16x128xf32> to vector<16xf32>
    %147 = vector.shape_cast %146 : vector<16xf32> to vector<16x1xf32>
    %cst_46 = arith.constant 6.250000e-02 : f32
    %148 = vector.broadcast %cst_46 : f32 to vector<16x1xf32>
    %149 = arith.mulf %147, %148 : vector<16x1xf32>
    %150 = arith.mulf %144, %144 : vector<16x1xf32>
    %151 = arith.subf %149, %150 : vector<16x1xf32>
    %cst_47 = arith.constant 0.000000e+00 : f32
    %152 = vector.broadcast %cst_47 : f32 to vector<16x1xf32>
    %153 = arith.maximumf %151, %152 : vector<16x1xf32>
    %154 = vector.broadcast %144 : vector<16x1xf32> to vector<16x128xf32>
    %155 = arith.subf %140, %154 : vector<16x128xf32>
    %cst_48 = arith.constant 9.99999974E-6 : f32
    %156 = vector.broadcast %cst_48 : f32 to vector<16x1xf32>
    %157 = arith.addf %153, %156 : vector<16x1xf32>
    %158 = math.rsqrt %157 : vector<16x1xf32>
    %159 = vector.broadcast %158 : vector<16x1xf32> to vector<16x128xf32>
    %160 = arith.mulf %155, %159 : vector<16x128xf32>
    %161 = vector.broadcast %136 : vector<1x128xf32> to vector<16x128xf32>
    %162 = arith.mulf %160, %161 : vector<16x128xf32>
    %163 = vector.broadcast %137 : vector<1x128xf32> to vector<16x128xf32>
    %164 = arith.addf %162, %163 : vector<16x128xf32>
    %cst_49 = arith.constant 0.000000e+00 : f32
    %165 = vector.broadcast %cst_49 : f32 to vector<16x128xf32>
    %166 = arith.maximumf %164, %165 : vector<16x128xf32>
    %c0_50 = arith.constant 0 : index
    %c0_51 = arith.constant 0 : index
    %167 = vector.load %arg7[%c0_50, %c0_51] : memref<16x128xf32, #tpu.memory_space<vmem>>, vector<16x128xf32>
    tpu.vector_store %arg7[%c0_50, %c0_51], %166 {strides = array<i32>} : memref<16x128xf32, #tpu.memory_space<vmem>>, vector<16x128xf32>,
    return
  }
  func.func @transform_0(%arg0: i32) -> (i32, i32) {
    %c0_i32 = arith.constant 0 : i32
    %c0_i32_0 = arith.constant 0 : i32
    return %arg0, %c0_i32 : i32, i32
  }
  func.func @transform_1(%arg0: i32) -> (i32, i32) {
    %c0_i32 = arith.constant 0 : i32
    %c0_i32_0 = arith.constant 0 : i32
    %c0_i32_1 = arith.constant 0 : i32
    return %c0_i32, %c0_i32_0 : i32, i32
  }
  func.func @transform_2(%arg0: i32) -> (i32, i32) {
    %c0_i32 = arith.constant 0 : i32
    %c0_i32_0 = arith.constant 0 : i32
    %c0_i32_1 = arith.constant 0 : i32
    return %c0_i32, %c0_i32_0 : i32, i32
  }
  func.func @transform_3(%arg0: i32) -> (i32, i32) {
    %c0_i32 = arith.constant 0 : i32
    %c0_i32_0 = arith.constant 0 : i32
    %c0_i32_1 = arith.constant 0 : i32
    return %c0_i32, %c0_i32_0 : i32, i32
  }
  func.func @transform_4(%arg0: i32) -> (i32, i32) {
    %c0_i32 = arith.constant 0 : i32
    %c0_i32_0 = arith.constant 0 : i32
    %c0_i32_1 = arith.constant 0 : i32
    return %c0_i32, %c0_i32_0 : i32, i32
  }
  func.func @transform_5(%arg0: i32) -> (i32, i32) {
    %c0_i32 = arith.constant 0 : i32
    %c0_i32_0 = arith.constant 0 : i32
    %c0_i32_1 = arith.constant 0 : i32
    return %c0_i32, %c0_i32_0 : i32, i32
  }
  func.func @transform_6(%arg0: i32) -> (i32, i32) {
    %c0_i32 = arith.constant 0 : i32
    %c0_i32_0 = arith.constant 0 : i32
    return %arg0, %c0_i32 : i32, i32
  }
}

</mosaic_0001>

<bundles_post_ra>
// kernel: tpu_custom_call.1
= control target key start
LH: loop header
LB: loop body
LE: loop exit
PB: predicated region body
PF: predicated region fallthrough
CT: control target
= control target key end

     0   :  { %11 = vsyncpa [#allocation3], 0  ;;  %s1350_s0 = inlined_call_operand.hbm [shape: bf16[16,128], index: 0, kind: input, shape index: {}]   ;;  %s1351_s1 = inlined_call_operand.hbm [shape: bf16[128,128], index: 1, kind: input, shape index: {}]   ;;  %s1352_s2 = inlined_call_operand.hbm [shape: bf16[128,128], index: 2, kind: input, shape index: {}]   ;;  %s1353_s3 = inlined_call_operand.hbm [shape: bf16[128,128], index: 3, kind: input, shape index: {}]   ;;  %s1354_s4 = inlined_call_operand.vmem [shape: f32[8,128], index: 4, kind: input, shape index: {}]   ;;  %s1355_s5 = inlined_call_operand.vmem [shape: f32[8,128], index: 5, kind: input, shape index: {}]   ;;  %s1356_s6 = inlined_call_operand.hbm [shape: f32[16,128], index: 6, kind: output, shape index: {}]  }
   0x1   :  { %12 = vsyncpa [#allocation6], 0 }
   0x2   :  { %13 = vsyncpa [#allocation9], 0 }
   0x3   :  { %14 = vsyncpa [#allocation4], 0  ;;  %s1068_s21 = smov [#allocation5]   ;;  %s1069_s23 = smov [#allocation2]  }
   0x4   :  { %s32_s22 = sshll.u32 %s1068_s21, 4  ;;  %s20_s24 = sshll.u32 %s1069_s23, 4  ;;  %s33_s22 = int_to_ptr.vmem [resolvable:$true] %s32_s22  ;;  %s1114_s24 = int_to_ptr.vmem [resolvable:$true] %s20_s24 }
   0x5   :  { %s950_s27 = scalar_lea.hbm %s1351_s1, 1024 }
   0x6   :  { %p951_p0 = scmp.ne.s32.totalorder %s1351_s1, %s950_s27  ;;  %p954_p1 = scmp.lt.u32.totalorder %s950_s27, %s1351_s1 }
   0x8   :  { %p956_p2 = pnand %p954_p1, %p951_p0 }
   0xa   :  { %959 = shalt.err (!%p956_p2)
}
   0xb   :  { %s960_s8 = scalar_lea.vmem %s33_s22, 1024  ;;  %p965_p4 = scmp.lt.s32.totalorder %s33_s22, %s33_s22 }
   0xc   :  { %p961_p3 = scmp.ne.s32.totalorder %s33_s22, %s960_s8  ;;  %p966_p5 = scmp.lt.s32.totalorder %s960_s8, %s960_s8 }
   0xe   :  { %p967_p6 = por %p966_p5, %p965_p4 }
  0x10   :  { %p968_p7 = pnand %p967_p6, %p961_p3 }
  0x12   :  { %971 = shalt.err (!%p968_p7)
}
  0x13   :  { %s1070_s9 = smov 64   ;;  %s1071_s10 = smov 4  }
  0x14   :  { %38 = dma.hbm_to_vmem [thread:$0]  %s1351_s1, 1024, %s33_s22, [#allocation6], %s1070_s9, %s1070_s9, %s1071_s10  }
  0x15   :  { %s972_s15 = scalar_lea.hbm %s1350_s0, 128 }
  0x16   :  { %p973_p8 = scmp.ne.s32.totalorder %s1350_s0, %s972_s15  ;;  %p976_p9 = scmp.lt.u32.totalorder %s972_s15, %s1350_s0 }
  0x18   :  { %p978_p10 = pnand %p976_p9, %p973_p8 }
  0x1a   :  { %981 = shalt.err (!%p978_p10)
}
  0x1b   :  { %s982_s20 = scalar_lea.vmem %s1114_s24, 128  ;;  %p987_p12 = scmp.lt.s32.totalorder %s1114_s24, %s1114_s24 }
  0x1c   :  { %p983_p11 = scmp.ne.s32.totalorder %s1114_s24, %s982_s20  ;;  %p988_p13 = scmp.lt.s32.totalorder %s982_s20, %s982_s20 }
  0x1e   :  { %p989_p0 = por %p988_p13, %p987_p12 }
  0x20   :  { %p990_p1 = pnand %p989_p0, %p983_p11 }
  0x22   :  { %993 = shalt.err (!%p990_p1)
}
  0x23   :  { %26 = dma.hbm_to_vmem [thread:$0]  %s1350_s0, 128, %s1114_s24, [#allocation3], %s1070_s9, %s1070_s9, %s1071_s10  }
  0x24   :  { %s1072_s22 = smov [#allocation7]   ;;  %s1073_s25 = smov [#allocation8]  }
  0x25   :  { %s44_s23 = sshll.u32 %s1072_s22, 4  ;;  %s56_s26 = sshll.u32 %s1073_s25, 4  ;;  %s45_s23 = int_to_ptr.vmem [resolvable:$true] %s44_s23  ;;  %s1151_s26 = int_to_ptr.vmem [resolvable:$true] %s56_s26 }
  0x26   :  { %s994_s29 = scalar_lea.hbm %s1352_s2, 1024 }
  0x27   :  { %p995_p2 = scmp.ne.s32.totalorder %s1352_s2, %s994_s29  ;;  %p998_p3 = scmp.lt.u32.totalorder %s994_s29, %s1352_s2 }
  0x29   :  { %p1000_p4 = pnand %p998_p3, %p995_p2 }
  0x2b   :  { %1003 = shalt.err (!%p1000_p4)
}
  0x2c   :  { %s1004_s0 = scalar_lea.vmem %s45_s23, 1024  ;;  %p1009_p6 = scmp.lt.s32.totalorder %s45_s23, %s45_s23 }
  0x2d   :  { %p1005_p5 = scmp.ne.s32.totalorder %s45_s23, %s1004_s0  ;;  %p1010_p7 = scmp.lt.s32.totalorder %s1004_s0, %s1004_s0 }
  0x2f   :  { %p1011_p8 = por %p1010_p7, %p1009_p6 }
  0x31   :  { %p1012_p9 = pnand %p1011_p8, %p1005_p5 }
  0x33   :  { %1015 = shalt.err (!%p1012_p9)
}
  0x34   :  { %50 = dma.hbm_to_vmem [thread:$0]  %s1352_s2, 1024, %s45_s23, [#allocation6], %s1070_s9, %s1070_s9, %s1071_s10  }
  0x35   :  { %s1016_s15 = scalar_lea.hbm %s1353_s3, 1024 }
  0x36   :  { %p1017_p10 = scmp.ne.s32.totalorder %s1353_s3, %s1016_s15  ;;  %p1020_p11 = scmp.lt.u32.totalorder %s1016_s15, %s1353_s3 }
  0x38   :  { %p1022_p12 = pnand %p1020_p11, %p1017_p10 }
  0x3a   :  { %1025 = shalt.err (!%p1022_p12)
}
  0x3b   :  { %s1026_s20 = scalar_lea.vmem %s1151_s26, 1024  ;;  %p1031_p0 = scmp.lt.s32.totalorder %s1151_s26, %s1151_s26 }
  0x3c   :  { %p1027_p13 = scmp.ne.s32.totalorder %s1151_s26, %s1026_s20  ;;  %p1032_p1 = scmp.lt.s32.totalorder %s1026_s20, %s1026_s20 }
  0x3e   :  { %p1033_p2 = por %p1032_p1, %p1031_p0 }
  0x40   :  { %p1034_p3 = pnand %p1033_p2, %p1027_p13 }
  0x42   :  { %1037 = shalt.err (!%p1034_p3)
}
  0x43   :  { %62 = dma.hbm_to_vmem [thread:$0]  %s1353_s3, 1024, %s1151_s26, [#allocation9], %s1070_s9, %s1070_s9, %s1071_s10  }
  0x44   :  { %1060 = dma.done.wait [#allocation3], 128  }
  0x45   :  { %1061 = vsyncadd [#allocation3], 4294967168 }
  0x46   :  { %1062 = dma.done.wait [#allocation6], 2048  }
  0x47   :  { %1063 = vsyncadd [#allocation6], 4294965248 }
  0x48   :  { %1064 = dma.done.wait [#allocation9], 1024  }
  0x49   :  { %1065 = vsyncadd [#allocation9], 4294966272  ;;  %v1074_v0 = vmov 0.0   ;;  %vm1075_vm0 = vmmov 0   ;;  %v905_v1 = vld [vmem:[#allocation5] sm:$0xff]   ;;  %v906_v2 = vld [vmem:[#allocation5 + $0x8] sm:$0xff]   ;;  %v100_v10 = vlaneseq }
  0x4a   :  { %794 = vmatprep.subr.bf16.mxu0 %v1074_v0  ;;  %810 = vmatprep.mubr.msk.bf16.mxu0 %vm1075_vm0, %v1074_v0  ;;  %v907_v3 = vld [vmem:[#allocation5 + $0x10] sm:$0xff]   ;;  %v908_v4 = vld [vmem:[#allocation5 + $0x18] sm:$0xff]   ;;  %v909_v5 = vld [vmem:[#allocation5 + $0x20] sm:$0xff]  }
  0x4b   :  { %814 = vmatprep.subr.bf16.mxu1 %v1074_v0  ;;  %830 = vmatprep.mubr.msk.bf16.mxu1 %vm1075_vm0, %v1074_v0  ;;  %v910_v6 = vld [vmem:[#allocation5 + $0x28] sm:$0xff]   ;;  %v911_v7 = vld [vmem:[#allocation5 + $0x30] sm:$0xff]   ;;  %v912_v8 = vld [vmem:[#allocation5 + $0x38] sm:$0xff]   ;;  %v1204_v11 = vshrl.u32 %v100_v10, 7 }
  0x4c   :  { %795 = vmatpush3.bf16.msra.mxu0 %v905_v1  ;;  %v913_v9 = vld [vmem:[#allocation2] sm:$0xff]   ;;  %v1225_v23 = vld [vmem:[#allocation7] sm:$0xff]   ;;  %v1231_v24 = vld [vmem:[#allocation7 + $0x8] sm:$0xff]  }
  0x4d   :  { %796 = vmatprep.subr.bf16.mxu0 %v1074_v0  ;;  %v102_v12 = vsub.s32 0, %v1204_v11  ;;  %v1210_v13 = vld [vmem:[%s1354_s4] sm:$0xff]  ;;  %815 = vmatpush3.bf16.msra.mxu1 %v1225_v23  ;;  %v1237_v25 = vld [vmem:[#allocation7 + $0x10] sm:$0xff]   ;;  %v1246_v27 = vld [vmem:[#allocation7 + $0x20] sm:$0xff]   ;;  %v229_v47 = vsub.s32 1, %v1204_v11  ;;  %v235_v50 = vsub.s32 2, %v1204_v11 }
  0x4e   :  { %816 = vmatprep.subr.bf16.mxu1 %v1074_v0  ;;  %v1243_v26 = vld [vmem:[#allocation7 + $0x18] sm:$0xff]   ;;  %v1252_v28 = vld [vmem:[#allocation7 + $0x28] sm:$0xff]   ;;  %v920_v29 = vld [vmem:[#allocation7 + $0x30] sm:$0xff]   ;;  %v260_v1 = vsub.s32 3, %v1204_v11 }
  0x4f   :  { %v103_v14 = vrot.slane %v1210_v13, %v102_v12  ;;  %v921_v30 = vld [vmem:[#allocation7 + $0x38] sm:$0xff]   ;;  %v230_v49 = vrot.slane %v1210_v13, %v229_v47  ;;  %v236_v55 = vrot.slane %v1210_v13, %v235_v50 }
  0x50   :  { %797 = vmatpush3.bf16.msra.mxu0 %v906_v2  ;;  %v1292_v2 = vrot.slane %v1210_v13, %v260_v1 }
  0x51   :  { %798 = vmatprep.subr.bf16.mxu0 %v1074_v0  ;;  %817 = vmatpush3.bf16.msra.mxu1 %v1231_v24 }
  0x52   :  { %818 = vmatprep.subr.bf16.mxu1 %v1074_v0 }
  0x54   :  { %799 = vmatpush3.bf16.msra.mxu0 %v907_v3 }
  0x55   :  { %800 = vmatprep.subr.bf16.mxu0 %v1074_v0  ;;  %819 = vmatpush3.bf16.msra.mxu1 %v1237_v25 }
  0x56   :  { %820 = vmatprep.subr.bf16.mxu1 %v1074_v0 }
  0x58   :  { %801 = vmatpush3.bf16.msra.mxu0 %v908_v4 }
  0x59   :  { %802 = vmatprep.subr.bf16.mxu0 %v1074_v0  ;;  %821 = vmatpush3.bf16.msra.mxu1 %v1243_v26 }
  0x5a   :  { %822 = vmatprep.subr.bf16.mxu1 %v1074_v0 }
  0x5c   :  { %803 = vmatpush3.bf16.msra.mxu0 %v909_v5 }
  0x5d   :  { %804 = vmatprep.subr.bf16.mxu0 %v1074_v0  ;;  %823 = vmatpush3.bf16.msra.mxu1 %v1246_v27 }
  0x5e   :  { %824 = vmatprep.subr.bf16.mxu1 %v1074_v0 }
  0x60   :  { %805 = vmatpush3.bf16.msra.mxu0 %v910_v6 }
  0x61   :  { %806 = vmatprep.subr.bf16.mxu0 %v1074_v0  ;;  %825 = vmatpush3.bf16.msra.mxu1 %v1252_v28 }
  0x62   :  { %826 = vmatprep.subr.bf16.mxu1 %v1074_v0 }
  0x64   :  { %807 = vmatpush3.bf16.msra.mxu0 %v911_v7 }
  0x65   :  { %808 = vmatprep.subr.bf16.mxu0 %v1074_v0  ;;  %827 = vmatpush3.bf16.msra.mxu1 %v920_v29 }
  0x66   :  { %828 = vmatprep.subr.bf16.mxu1 %v1074_v0 }
  0x68   :  { %809 = vmatpush3.bf16.msra.mxu0 %v912_v8 }
  0x69   :  { %834 = vmatprep.subr.bf16.mxu0 %v1074_v0  ;;  %829 = vmatpush3.bf16.msra.mxu1 %v921_v30 }
  0x6a   :  { %854 = vmatprep.subr.bf16.mxu1 %v1074_v0 }
  0x6b   :  { %811 = vmatmul.mubr.bf16.vlgmr.msra.gmra.mrb[0].mxu0 %v913_v9 }
  0x6c   :  { %850 = vmatprep.mubr.msk.bf16.mxu0 %vm1075_vm0, %v1074_v0  ;;  %835 = vmatpush3.bf16.msra.mxu0 %v1225_v23 }
  0x6d   :  { %836 = vmatprep.subr.bf16.mxu0 %v1074_v0 }
  0x70   :  { %837 = vmatpush3.bf16.msra.mxu0 %v1231_v24 }
  0x71   :  { %838 = vmatprep.subr.bf16.mxu0 %v1074_v0 }
  0x74   :  { %839 = vmatpush3.bf16.msra.mxu0 %v1237_v25 }
  0x75   :  { %840 = vmatprep.subr.bf16.mxu0 %v1074_v0 }
  0x78   :  { %841 = vmatpush3.bf16.msra.mxu0 %v1243_v26 }
  0x79   :  { %842 = vmatprep.subr.bf16.mxu0 %v1074_v0 }
  0x7c   :  { %843 = vmatpush3.bf16.msra.mxu0 %v1246_v27 }
  0x7d   :  { %844 = vmatprep.subr.bf16.mxu0 %v1074_v0 }
  0x80   :  { %845 = vmatpush3.bf16.msra.mxu0 %v1252_v28 }
  0x81   :  { %846 = vmatprep.subr.bf16.mxu0 %v1074_v0 }
  0x84   :  { %847 = vmatpush3.bf16.msra.mxu0 %v920_v29 }
  0x85   :  { %848 = vmatprep.subr.bf16.mxu0 %v1074_v0 }
  0x88   :  { %849 = vmatpush3.bf16.msra.mxu0 %v921_v30 }
  0x89   :  { %874 = vmatprep.subr.bf16.mxu0 %v1074_v0 }
 0x13e   :  { %v192_v15 = vpop.f32.mrb[0].mxu0 }
 0x13f   :  { %v1215_v16 = vadd.f32 %v192_v15, %v103_v14  ;;  %v812_v17 = vpop.f32.mrb[1].mxu0 }
 0x140   :  { %v195_v18 = vpop.f32.mrb[2].mxu0 }
 0x141   :  { %v1217_v19 = vadd.f32 %v195_v18, %v103_v14  ;;  %v813_v20 = vpop.f32.mrb[3].mxu0  ;;  %199 = vadd.xlane.f32.xlu0 %v1215_v16  ;;  %v205_v21 = vmul.f32 %v1215_v16, %v1215_v16 }
 0x143   :  { %207 = vadd.xlane.f32.xlu1 %v205_v21  ;;  %v206_v22 = vmul.f32 %v1217_v19, %v1217_v19 }
 0x145   :  { %201 = vadd.xlane.f32.xlu0 %v1217_v19 }
 0x147   :  { %209 = vadd.xlane.f32.xlu1 %v206_v22 }
 0x1ce   :  { %v200_v31 = vpop.xlane.xlu0 %199 }
 0x1cf   :  { %v203_v32 = vmul.f32 0.03125, %v200_v31 }
 0x1d0   :  { %v208_v33 = vpop.xlane.xlu1 %207 }
 0x1d1   :  { %v213_v34 = vmul.f32 %v203_v32, %v203_v32  ;;  %v211_v35 = vmul.f32 0.03125, %v208_v33  ;;  %v219_v48 = vsub.f32 %v1215_v16, %v203_v32  ;;  %v383_v32 = vsub.s32 4, %v1204_v11 }
 0x1d2   :  { %v202_v36 = vpop.xlane.xlu0 %201  ;;  %v389_v33 = vsub.s32 5, %v1204_v11 }
 0x1d3   :  { %v215_v37 = vsub.f32 %v211_v35, %v213_v34  ;;  %v204_v38 = vmul.f32 0.03125, %v202_v36  ;;  %v1299_v34 = vrot.slane %v1210_v13, %v383_v32 }
 0x1d4   :  { %v210_v39 = vpop.xlane.xlu1 %209 }
 0x1d5   :  { %v217_v40 = vmax.f32 %v215_v37, 0.0  ;;  %v214_v41 = vmul.f32 %v204_v38, %v204_v38  ;;  %v212_v42 = vmul.f32 0.03125, %v210_v39  ;;  %v220_v53 = vsub.f32 %v1217_v19, %v204_v38 }
 0x1d6   :  { %v1302_v37 = vrot.slane %v1210_v13, %v389_v33 }
 0x1d7   :  { %v221_v43 = vadd.f32 1e-05, %v217_v40  ;;  %v216_v44 = vsub.f32 %v212_v42, %v214_v41 }
 0x1d9   :  { %930 = vrsqrt.f32 %v221_v43  ;;  %v218_v45 = vmax.f32 %v216_v44, 0.0 }
 0x1db   :  { %v222_v46 = vadd.f32 1e-05, %v218_v45 }
 0x1dd   :  { %932 = vrsqrt.f32 %v222_v46 }
 0x1e3   :  { %v931_v51 = vpop.eup %930 }
 0x1e4   :  { %v225_v52 = vmul.f32 %v931_v51, %v219_v48 }
 0x1e6   :  { %v231_v54 = vmul.f32 %v230_v49, %v225_v52 }
 0x1e7   :  { %v933_v56 = vpop.eup %932 }
 0x1e8   :  { %v226_v57 = vmul.f32 %v933_v56, %v220_v53  ;;  %v237_v59 = vadd.f32 %v236_v55, %v231_v54 }
 0x1ea   :  { %v232_v58 = vmul.f32 %v230_v49, %v226_v57  ;;  %v239_v61 = vmax.f32 %v237_v59, 0.0 }
 0x1ec   :  { %v238_v60 = vadd.f32 %v236_v55, %v232_v58 }
 0x1ee   :  { %v240_v62 = vmax.f32 %v238_v60, 0.0 }
 0x1f0   :  { %v257_v63 = vpack.c.bf16 %v240_v62, %v239_v61 }
 0x1f2   :  { %831 = vmatmul.mubr.bf16.vlgmr.msra.gmra.mrb[0].mxu1 %v257_v63 }
 0x1f3   :  { %855 = vmatpush3.bf16.msra.mxu1 %v1225_v23  ;;  %870 = vmatprep.mubr.msk.bf16.mxu1 %vm1075_vm0, %v1074_v0 }
 0x1f4   :  { %856 = vmatprep.subr.bf16.mxu1 %v1074_v0 }
 0x1f7   :  { %857 = vmatpush3.bf16.msra.mxu1 %v1231_v24 }
 0x1f8   :  { %858 = vmatprep.subr.bf16.mxu1 %v1074_v0 }
 0x1fb   :  { %859 = vmatpush3.bf16.msra.mxu1 %v1237_v25 }
 0x1fc   :  { %860 = vmatprep.subr.bf16.mxu1 %v1074_v0 }
 0x1ff   :  { %861 = vmatpush3.bf16.msra.mxu1 %v1243_v26 }
 0x200   :  { %862 = vmatprep.subr.bf16.mxu1 %v1074_v0 }
 0x203   :  { %863 = vmatpush3.bf16.msra.mxu1 %v1246_v27 }
 0x204   :  { %864 = vmatprep.subr.bf16.mxu1 %v1074_v0 }
 0x207   :  { %865 = vmatpush3.bf16.msra.mxu1 %v1252_v28 }
 0x208   :  { %866 = vmatprep.subr.bf16.mxu1 %v1074_v0 }
 0x20b   :  { %867 = vmatpush3.bf16.msra.mxu1 %v920_v29 }
 0x20c   :  { %868 = vmatprep.subr.bf16.mxu1 %v1074_v0 }
 0x20f   :  { %869 = vmatpush3.bf16.msra.mxu1 %v921_v30 }
 0x2c5   :  { %v344_v3 = vpop.f32.mrb[0].mxu1 }
 0x2c6   :  { %v345_v4 = vadd.f32 %v344_v3, %v1292_v2  ;;  %v832_v5 = vpop.f32.mrb[1].mxu1 }
 0x2c7   :  { %v347_v6 = vpop.f32.mrb[2].mxu1 }
 0x2c8   :  { %v351_v7 = vadd.f32 %v345_v4, %v239_v61  ;;  %v348_v8 = vadd.f32 %v347_v6, %v1292_v2  ;;  %v833_v9 = vpop.f32.mrb[3].mxu1 }
 0x2ca   :  { %v352_v10 = vadd.f32 %v348_v8, %v240_v62  ;;  %353 = vadd.xlane.f32.xlu0 %v351_v7  ;;  %v359_v14 = vmul.f32 %v351_v7, %v351_v7 }
 0x2cc   :  { %355 = vadd.xlane.f32.xlu1 %v352_v10  ;;  %v360_v15 = vmul.f32 %v352_v10, %v352_v10 }
 0x2ce   :  { %361 = vadd.xlane.f32.xlu0 %v359_v14 }
 0x2d0   :  { %363 = vadd.xlane.f32.xlu1 %v360_v15 }
 0x357   :  { %v354_v16 = vpop.xlane.xlu0 %353 }
 0x358   :  { %v357_v17 = vmul.f32 0.03125, %v354_v16 }
 0x359   :  { %v356_v18 = vpop.xlane.xlu1 %355 }
 0x35a   :  { %v358_v19 = vmul.f32 0.03125, %v356_v18  ;;  %v367_v21 = vmul.f32 %v357_v17, %v357_v17  ;;  %v373_v35 = vsub.f32 %v351_v7, %v357_v17 }
 0x35b   :  { %v362_v20 = vpop.xlane.xlu0 %361 }
 0x35c   :  { %v365_v22 = vmul.f32 0.03125, %v362_v20  ;;  %v368_v24 = vmul.f32 %v358_v19, %v358_v19  ;;  %v374_v38 = vsub.f32 %v352_v10, %v358_v19 }
 0x35d   :  { %v364_v23 = vpop.xlane.xlu1 %363 }
 0x35e   :  { %v369_v25 = vsub.f32 %v365_v22, %v367_v21  ;;  %v366_v26 = vmul.f32 0.03125, %v364_v23 }
 0x360   :  { %v371_v27 = vmax.f32 %v369_v25, 0.0  ;;  %v370_v28 = vsub.f32 %v366_v26, %v368_v24 }
 0x362   :  { %v375_v29 = vadd.f32 1e-05, %v371_v27  ;;  %v372_v30 = vmax.f32 %v370_v28, 0.0 }
 0x364   :  { %934 = vrsqrt.f32 %v375_v29  ;;  %v376_v31 = vadd.f32 1e-05, %v372_v30 }
 0x366   :  { %936 = vrsqrt.f32 %v376_v31 }
 0x36e   :  { %v935_v36 = vpop.eup %934 }
 0x36f   :  { %v379_v39 = vmul.f32 %v935_v36, %v373_v35 }
 0x370   :  { %v937_v40 = vpop.eup %936 }
 0x371   :  { %v380_v41 = vmul.f32 %v937_v40, %v374_v38  ;;  %v385_v42 = vmul.f32 %v1299_v34, %v379_v39 }
 0x373   :  { %v386_v43 = vmul.f32 %v1299_v34, %v380_v41  ;;  %v391_v44 = vadd.f32 %v1302_v37, %v385_v42  ;;  %v922_v42 = vld [vmem:[#allocation8] sm:$0xff]  }
 0x375   :  { %v392_v45 = vadd.f32 %v1302_v37, %v386_v43  ;;  %v393_v46 = vmax.f32 %v391_v44, 0.0  ;;  %v923_v43 = vld [vmem:[#allocation8 + $0x8] sm:$0xff]   ;;  %v924_v44 = vld [vmem:[#allocation8 + $0x10] sm:$0xff]  }
 0x377   :  { %v394_v48 = vmax.f32 %v392_v45, 0.0  ;;  %v926_v45 = vld [vmem:[#allocation8 + $0x20] sm:$0xff]  }
 0x379   :  { %v395_v49 = vpack.c.bf16 %v394_v48, %v393_v46 }
 0x37b   :  { %851 = vmatmul.mubr.bf16.vlgmr.msra.gmra.mrb[4].mxu0 %v395_v49  ;;  %v929_v49 = vld [vmem:[#allocation8 + $0x38] sm:$0xff]  }
 0x37c   :  { %890 = vmatprep.mubr.msk.bf16.mxu0 %vm1075_vm0, %v1074_v0  ;;  %875 = vmatpush3.bf16.msra.mxu0 %v922_v42 }
 0x37d   :  { %876 = vmatprep.subr.bf16.mxu0 %v1074_v0 }
 0x380   :  { %877 = vmatpush3.bf16.msra.mxu0 %v923_v43 }
 0x381   :  { %878 = vmatprep.subr.bf16.mxu0 %v1074_v0 }
 0x384   :  { %879 = vmatpush3.bf16.msra.mxu0 %v924_v44 }
 0x385   :  { %880 = vmatprep.subr.bf16.mxu0 %v1074_v0 }
 0x44e   :  { %v430_v13 = vpop.f32.mrb[4].mxu0 }
 0x44f   :  { %v431_v51 = vadd.f32 %v430_v13, %v1292_v2  ;;  %v852_v52 = vpop.f32.mrb[5].mxu0 }
 0x450   :  { %v433_v53 = vpop.f32.mrb[6].mxu0 }
 0x451   :  { %v437_v54 = vadd.f32 %v431_v51, %v393_v46  ;;  %v434_v55 = vadd.f32 %v433_v53, %v1292_v2  ;;  %v853_v56 = vpop.f32.mrb[7].mxu0  ;;  %v927_v46 = vld [vmem:[#allocation8 + $0x28] sm:$0xff]  }
 0x453   :  { %v438_v57 = vadd.f32 %v434_v55, %v394_v48  ;;  %439 = vadd.xlane.f32.xlu0 %v437_v54  ;;  %v445_v58 = vmul.f32 %v437_v54, %v437_v54  ;;  %v928_v48 = vld [vmem:[#allocation8 + $0x30] sm:$0xff]  }
 0x455   :  { %441 = vadd.xlane.f32.xlu1 %v438_v57  ;;  %v446_v59 = vmul.f32 %v438_v57, %v438_v57 }
 0x457   :  { %447 = vadd.xlane.f32.xlu0 %v445_v58 }
 0x459   :  { %449 = vadd.xlane.f32.xlu1 %v446_v59 }
 0x4e0   :  { %v440_v60 = vpop.xlane.xlu0 %439 }
 0x4e1   :  { %v443_v61 = vmul.f32 0.03125, %v440_v60 }
 0x4e2   :  { %v442_v62 = vpop.xlane.xlu1 %441 }
 0x4e3   :  { %v444_v63 = vmul.f32 0.03125, %v442_v62  ;;  %v453_v3 = vmul.f32 %v443_v61, %v443_v61  ;;  %v459_v17 = vsub.f32 %v437_v54, %v443_v61 }
 0x4e4   :  { %v448_v1 = vpop.xlane.xlu0 %447 }
 0x4e5   :  { %v451_v4 = vmul.f32 0.03125, %v448_v1  ;;  %v454_v6 = vmul.f32 %v444_v63, %v444_v63  ;;  %v460_v19 = vsub.f32 %v438_v57, %v444_v63 }
 0x4e6   :  { %v450_v5 = vpop.xlane.xlu1 %449 }
 0x4e7   :  { %v455_v7 = vsub.f32 %v451_v4, %v453_v3  ;;  %v452_v8 = vmul.f32 0.03125, %v450_v5 }
 0x4e9   :  { %v457_v9 = vmax.f32 %v455_v7, 0.0  ;;  %v456_v10 = vsub.f32 %v452_v8, %v454_v6 }
 0x4eb   :  { %v461_v14 = vadd.f32 1e-05, %v457_v9  ;;  %v458_v15 = vmax.f32 %v456_v10, 0.0 }
 0x4ed   :  { %938 = vrsqrt.f32 %v461_v14  ;;  %v462_v16 = vadd.f32 1e-05, %v458_v15 }
 0x4ef   :  { %940 = vrsqrt.f32 %v462_v16 }
 0x4f7   :  { %v939_v18 = vpop.eup %938 }
 0x4f8   :  { %v465_v20 = vmul.f32 %v939_v18, %v459_v17 }
 0x4f9   :  { %v941_v21 = vpop.eup %940 }
 0x4fa   :  { %v466_v22 = vmul.f32 %v941_v21, %v460_v19  ;;  %v467_v23 = vmul.f32 %v465_v20, %v1299_v34  ;;  %v81_v19 = vld [vmem:[%s1355_s5] sm:$0xff]  ;;  %s1076_s5 = smov [#allocation10]  }
 0x4fb   :  { %v571_v20 = vrot.slane %v81_v19, %v102_v12  ;;  %v692_v44 = vrot.slane %v81_v19, %v229_v47  ;;  %s710_s21 = sshll.u32 %s1076_s5, 4  ;;  %s711_s21 = int_to_ptr.vmem [resolvable:$true] %s710_s21 }
 0x4fc   :  { %v468_v24 = vmul.f32 %v466_v22, %v1299_v34  ;;  %v469_v25 = vadd.f32 %v467_v23, %v1302_v37  ;;  %s1038_s22 = scalar_lea.vmem %s711_s21, 256  ;;  %p1043_p5 = scmp.lt.s32.totalorder %s711_s21, %s711_s21 }
 0x4fd   :  { %p1039_p4 = scmp.ne.s32.totalorder %s711_s21, %s1038_s22  ;;  %p1044_p6 = scmp.lt.s32.totalorder %s1038_s22, %s1038_s22 }
 0x4fe   :  { %v470_v26 = vadd.f32 %v468_v24, %v1302_v37  ;;  %v471_v27 = vmax.f32 %v469_v25, 0.0 }
 0x4ff   :  { %p1045_p7 = por %p1044_p6, %p1043_p5 }
 0x500   :  { %v472_v28 = vmax.f32 %v470_v26, 0.0 }
 0x501   :  { %p1046_p8 = pnand %p1045_p7, %p1039_p4 }
 0x502   :  { %v473_v29 = vpack.c.bf16 %v472_v28, %v471_v27 }
 0x504   :  { %871 = vmatmul.mubr.bf16.vlgmr.msra.gmra.mrb[4].mxu1 %v473_v29 }
 0x5d7   :  { %v508_v30 = vpop.f32.mrb[4].mxu1 }
 0x5d8   :  { %v509_v31 = vadd.f32 %v508_v30, %v1292_v2  ;;  %v872_v32 = vpop.f32.mrb[5].mxu1 }
 0x5d9   :  { %v511_v33 = vpop.f32.mrb[6].mxu1 }
 0x5da   :  { %v515_v35 = vadd.f32 %v509_v31, %v471_v27  ;;  %v512_v36 = vadd.f32 %v511_v33, %v1292_v2  ;;  %v873_v38 = vpop.f32.mrb[7].mxu1  ;;  %v925_v2 = vld [vmem:[#allocation8 + $0x18] sm:$0xff]  }
 0x5db   :  { %881 = vmatpush3.bf16.msra.mxu0 %v925_v2 }
 0x5dc   :  { %v516_v39 = vadd.f32 %v512_v36, %v472_v28  ;;  %517 = vadd.xlane.f32.xlu0 %v515_v35  ;;  %v523_v40 = vmul.f32 %v515_v35, %v515_v35  ;;  %882 = vmatprep.subr.bf16.mxu0 %v1074_v0 }
 0x5de   :  { %519 = vadd.xlane.f32.xlu1 %v516_v39  ;;  %v524_v41 = vmul.f32 %v516_v39, %v516_v39 }
 0x5df   :  { %883 = vmatpush3.bf16.msra.mxu0 %v926_v45 }
 0x5e0   :  { %525 = vadd.xlane.f32.xlu0 %v523_v40  ;;  %884 = vmatprep.subr.bf16.mxu0 %v1074_v0 }
 0x5e2   :  { %527 = vadd.xlane.f32.xlu1 %v524_v41 }
 0x5e3   :  { %885 = vmatpush3.bf16.msra.mxu0 %v927_v46  ;;  %v698_v46 = vrot.slane %v81_v19, %v235_v50 }
 0x5e4   :  { %886 = vmatprep.subr.bf16.mxu0 %v1074_v0 }
 0x5e7   :  { %887 = vmatpush3.bf16.msra.mxu0 %v928_v48 }
 0x5e8   :  { %888 = vmatprep.subr.bf16.mxu0 %v1074_v0 }
 0x5eb   :  { %889 = vmatpush3.bf16.msra.mxu0 %v929_v49 }
 0x669   :  { %v518_v13 = vpop.xlane.xlu0 %517 }
 0x66a   :  { %v521_v51 = vmul.f32 0.03125, %v518_v13 }
 0x66b   :  { %v520_v52 = vpop.xlane.xlu1 %519 }
 0x66c   :  { %v522_v53 = vmul.f32 0.03125, %v520_v52  ;;  %v531_v55 = vmul.f32 %v521_v51, %v521_v51  ;;  %v537_v0 = vsub.f32 %v515_v35, %v521_v51 }
 0x66d   :  { %v526_v54 = vpop.xlane.xlu0 %525 }
 0x66e   :  { %v529_v56 = vmul.f32 0.03125, %v526_v54  ;;  %v532_v58 = vmul.f32 %v522_v53, %v522_v53  ;;  %v538_v5 = vsub.f32 %v516_v39, %v522_v53 }
 0x66f   :  { %v528_v57 = vpop.xlane.xlu1 %527 }
 0x670   :  { %v533_v59 = vsub.f32 %v529_v56, %v531_v55  ;;  %v530_v60 = vmul.f32 0.03125, %v528_v57 }
 0x672   :  { %v535_v61 = vmax.f32 %v533_v59, 0.0  ;;  %v534_v62 = vsub.f32 %v530_v60, %v532_v58 }
 0x674   :  { %v539_v63 = vadd.f32 1e-05, %v535_v61  ;;  %v536_v1 = vmax.f32 %v534_v62, 0.0 }
 0x676   :  { %942 = vrsqrt.f32 %v539_v63  ;;  %v540_v3 = vadd.f32 1e-05, %v536_v1 }
 0x678   :  { %944 = vrsqrt.f32 %v540_v3 }
 0x680   :  { %v943_v4 = vpop.eup %942 }
 0x681   :  { %v543_v6 = vmul.f32 %v943_v4, %v537_v0 }
 0x682   :  { %v945_v7 = vpop.eup %944 }
 0x683   :  { %v544_v8 = vmul.f32 %v945_v7, %v538_v5  ;;  %v545_v9 = vmul.f32 %v543_v6, %v1299_v34 }
 0x685   :  { %v546_v10 = vmul.f32 %v544_v8, %v1299_v34  ;;  %v547_v14 = vadd.f32 %v545_v9, %v1302_v37 }
 0x687   :  { %v548_v15 = vadd.f32 %v546_v10, %v1302_v37  ;;  %v549_v16 = vmax.f32 %v547_v14, 0.0 }
 0x689   :  { %v550_v17 = vmax.f32 %v548_v15, 0.0 }
 0x68b   :  { %v551_v18 = vpack.c.bf16 %v550_v17, %v549_v16 }
 0x68d   :  { %891 = vmatmul.mubr.bf16.vlgmr.msra.gmra.mrb[8].mxu0 %v551_v18 }
 0x760   :  { %v654_v21 = vpop.f32.mrb[8].mxu0 }
 0x761   :  { %v655_v22 = vadd.f32 %v654_v21, %v571_v20  ;;  %v892_v23 = vpop.f32.mrb[9].mxu0 }
 0x762   :  { %v657_v24 = vpop.f32.mrb[10].mxu0 }
 0x763   :  { %v658_v34 = vadd.f32 %v657_v24, %v571_v20  ;;  %661 = vadd.xlane.f32.xlu0 %v655_v22  ;;  %v893_v25 = vpop.f32.mrb[11].mxu0  ;;  %v667_v37 = vmul.f32 %v655_v22, %v655_v22 }
 0x765   :  { %663 = vadd.xlane.f32.xlu1 %v658_v34  ;;  %v668_v26 = vmul.f32 %v658_v34, %v658_v34 }
 0x767   :  { %669 = vadd.xlane.f32.xlu0 %v667_v37 }
 0x769   :  { %671 = vadd.xlane.f32.xlu1 %v668_v26 }
 0x7f0   :  { %v662_v27 = vpop.xlane.xlu0 %661 }
 0x7f1   :  { %v665_v28 = vmul.f32 0.0625, %v662_v27 }
 0x7f2   :  { %v664_v29 = vpop.xlane.xlu1 %663 }
 0x7f3   :  { %v666_v30 = vmul.f32 0.0625, %v664_v29  ;;  %v675_v32 = vmul.f32 %v665_v28, %v665_v28  ;;  %v681_v2 = vsub.f32 %v655_v22, %v665_v28 }
 0x7f4   :  { %v670_v31 = vpop.xlane.xlu0 %669 }
 0x7f5   :  { %v673_v33 = vmul.f32 0.0625, %v670_v31  ;;  %v676_v35 = vmul.f32 %v666_v30, %v666_v30  ;;  %v682_v48 = vsub.f32 %v658_v34, %v666_v30 }
 0x7f6   :  { %v672_v12 = vpop.xlane.xlu1 %671 }
 0x7f7   :  { %v677_v36 = vsub.f32 %v673_v33, %v675_v32  ;;  %v674_v38 = vmul.f32 0.0625, %v672_v12 }
 0x7f9   :  { %v679_v39 = vmax.f32 %v677_v36, 0.0  ;;  %v678_v40 = vsub.f32 %v674_v38, %v676_v35 }
 0x7fb   :  { %v683_v41 = vadd.f32 1e-05, %v679_v39  ;;  %v680_v42 = vmax.f32 %v678_v40, 0.0 }
 0x7fd   :  { %946 = vrsqrt.f32 %v683_v41  ;;  %v684_v43 = vadd.f32 1e-05, %v680_v42 }
 0x7ff   :  { %948 = vrsqrt.f32 %v684_v43 }
 0x807   :  { %v947_v45 = vpop.eup %946 }
 0x808   :  { %v687_v49 = vmul.f32 %v947_v45, %v681_v2 }
 0x809   :  { %v949_v13 = vpop.eup %948 }
 0x80a   :  { %v688_v51 = vmul.f32 %v949_v13, %v682_v48  ;;  %v693_v52 = vmul.f32 %v692_v44, %v687_v49 }
 0x80c   :  { %v694_v53 = vmul.f32 %v692_v44, %v688_v51  ;;  %v699_v54 = vadd.f32 %v698_v46, %v693_v52 }
 0x80e   :  { %v700_v55 = vadd.f32 %v698_v46, %v694_v53  ;;  %v701_v56 = vmax.f32 %v699_v54, 0.0 }
 0x810   :  { %v702_v57 = vmax.f32 %v700_v55, 0.0  ;;  %703 = vst [vmem:[#allocation10] sm:$0xff] %v701_v56 }
 0x812   :  { %704 = vst [vmem:[#allocation10 + $0x8] sm:$0xff] %v702_v57 }
 0x813   :  { %1049 = shalt.err (!%p1046_p8)
}
 0x814   :  { %s1050_s26 = scalar_lea.hbm %s1356_s6, 256 }
 0x815   :  { %p1051_p9 = scmp.ne.s32.totalorder %s1356_s6, %s1050_s26  ;;  %p1054_p10 = scmp.lt.u32.totalorder %s1050_s26, %s1356_s6 }
 0x817   :  { %p1056_p11 = pnand %p1054_p10, %p1051_p9 }
 0x819   :  { %1059 = shalt.err (!%p1056_p11)
}
 0x81a   :  { %s1077_s7 = smov 128   ;;  %s1078_s8 = smov 8  }
 0x81b   :  { %716 = dma.vmem_to_hbm [thread:$0]  %s711_s21, 256, %s1356_s6, [#allocation4], %s1077_s7, %s1077_s7, %s1078_s8  }
 0x81c   :  { %1066 = dma.done.wait [#allocation4], 256  }
 0x81d   :  { %1067 = vsyncadd [#allocation4], 4294967040 }
 0x81e   :  { %720 = vsyncpa [#allocation3], 1 }
 0x81f   :  { %721 = vsyncpa [#allocation6], 1 }
 0x820   :  { %722 = vsyncpa [#allocation9], 1 }
 0x821   :  { %723 = vsyncpa [#allocation4], 1 }

</bundles_post_ra>
